<compile_context>
chip_gen: v7x
topology: tpu7x:2x2x1
jax: 0.10.0
libtpu: 0.0.40
codegen_flags: <defaults>
</compile_context>

<pallas_src>
import jax
import jax.numpy as jnp
from jax.experimental import pallas as pl
from jax.experimental.pallas import tpu as pltpu


def _stem_kernel(p_ref, w_ref, b_ref, o_ref):
    # p_ref: (tg, G*K)      lane-packed im2col patch tile (bf16 or f32)
    # w_ref: (G*K, G*Cout)  block-diagonal, BN-scale-folded conv weights
    # b_ref: (1, G*Cout)    folded BN bias (f32), tiled G times
    # o_ref: (tg, G*Cout)   lane-dense output tile (f32)
    acc = jnp.dot(p_ref[...], w_ref[...], preferred_element_type=jnp.float32)
    y = acc + b_ref[...]                                   # folded BN bias
    o_ref[...] = (y * jax.nn.sigmoid(y)).astype(o_ref.dtype)  # Swish


def _round_up(a, b):
    return (a + b - 1) // b * b


def stem_in_forward(x_nchw, conv_w, gamma, beta, run_mean, run_var,
                    eps=1e-5, compute_dtype=jnp.bfloat16):
    """x_nchw: (N, Cin, H, W) f32; conv_w: (Cout, Cin, 3, 3) f32."""
    N, Cin, H, W = x_nchw.shape
    Cout = conv_w.shape[0]
    stride, pad, k = 2, 1, 3
    Ho = (H + 2 * pad - k) // stride + 1
    Wo = (W + 2 * pad - k) // stride + 1
    K = k * k * Cin
    M = N * Ho * Wo

    # Lane-pack factor: pack G consecutive output rows so stored lane width
    # is G*Cout (=128 for Cout=32) -> unmasked vst instead of vst.msk.
    G = 128 // Cout if (Cout < 128 and 128 % Cout == 0) else 1

    # ---- glue (XLA): NCHW -> NHWC, zero pad, im2col ----
    x = jnp.transpose(x_nchw, (0, 2, 3, 1))                       # (N,H,W,Cin)
    x_pad = jnp.pad(x, ((0, 0), (pad, pad), (pad, pad), (0, 0)))
    taps = []
    for kh in range(k):
        for kw in range(k):
            taps.append(jax.lax.slice(
                x_pad,
                (0, kh, kw, 0),
                (N, kh + stride * (Ho - 1) + 1,
                 kw + stride * (Wo - 1) + 1, Cin),
                (1, stride, stride, 1)))                          # (N,Ho,Wo,Cin)
    patches = jnp.concatenate(taps, axis=-1).reshape(M, K)  # (kh,kw,cin) order

    # ---- fold BN (eval mode): scale into weights, bias kept separate ----
    s = gamma / jnp.sqrt(run_var + eps)                           # (Cout,)
    bias = (beta - run_mean * s).reshape(1, Cout)                 # f32
    w_mat = jnp.transpose(conv_w, (2, 3, 1, 0)).reshape(K, Cout) * s[None, :]

    # Block-diagonal replication: packed patch row r holds original rows
    # G*r .. G*r+G-1; kron(I_G, W) routes group g to output cols [g*Cout, ...).
    w_bd = jnp.kron(jnp.eye(G, dtype=w_mat.dtype), w_mat)         # (G*K, G*Cout)
    bias_t = jnp.tile(bias, (1, G)).astype(jnp.float32)           # (1, G*Cout)

    # ---- tile sizing: big M tiles, but keep >=2 grid steps for megacore ----
    tm_rows = min(4096, _round_up(max((M + 1) // 2, 8 * G), 8 * G))
    Mp = _round_up(M, tm_rows)
    if Mp != M:
        patches = jnp.pad(patches, ((0, Mp - M), (0, 0)))
    patches = patches.reshape(Mp // G, G * K).astype(compute_dtype)
    w_bd = w_bd.astype(compute_dtype)

    tg = tm_rows // G
    grid = (Mp // tm_rows,)

    out_packed = pl.pallas_call(
        _stem_kernel,
        out_shape=jax.ShapeDtypeStruct((Mp // G, G * Cout), jnp.float32),
        grid_spec=pltpu.PrefetchScalarGridSpec(
            num_scalar_prefetch=0,
            grid=grid,
            in_specs=[
                pl.BlockSpec((tg, G * K), lambda i: (i, 0)),
                pl.BlockSpec((G * K, G * Cout), lambda i: (0, 0)),
                pl.BlockSpec((1, G * Cout), lambda i: (0, 0)),
            ],
            out_specs=pl.BlockSpec((tg, G * Cout), lambda i: (i, 0)),
        ),
        compiler_params=pltpu.CompilerParams(
            dimension_semantics=("parallel",)),
    )(patches, w_bd, bias_t)

    out = out_packed.reshape(Mp, Cout)[:M].reshape(N, Ho, Wo, Cout)
    return jnp.transpose(out, (0, 3, 1, 2))  # back to NCHW


if __name__ == "__main__":
    # Small shapes consistent with the module: batch=2, w_in=4, spatial=16, w_out=32.
    N, Cin, H, W = 2, 4, 16, 16
    Cout = 32
    eps = 1e-5

    key = jax.random.PRNGKey(0)
    kx, kw, kg, kb, km, kv = jax.random.split(key, 6)
    x = jax.random.normal(kx, (N, Cin, H, W), dtype=jnp.float32)
    conv_w = jax.random.normal(kw, (Cout, Cin, 3, 3), dtype=jnp.float32) * 0.1
    gamma = 1.0 + 0.1 * jax.random.normal(kg, (Cout,), dtype=jnp.float32)
    beta = 0.1 * jax.random.normal(kb, (Cout,), dtype=jnp.float32)
    run_mean = 0.1 * jax.random.normal(km, (Cout,), dtype=jnp.float32)
    run_var = jnp.abs(jax.random.normal(kv, (Cout,), dtype=jnp.float32)) + 0.5

    # Pure-JAX reference (conv -> eval-mode BN -> Swish).
    ref = jax.lax.conv_general_dilated(
        x, conv_w, window_strides=(2, 2), padding=((1, 1), (1, 1)),
        dimension_numbers=("NCHW", "OIHW", "NCHW"))
    ref = (ref - run_mean[None, :, None, None]) / jnp.sqrt(
        run_var[None, :, None, None] + eps)
    ref = ref * gamma[None, :, None, None] + beta[None, :, None, None]
    ref = ref * jax.nn.sigmoid(ref)

    # 1) exact-semantics check (f32 compute path, tight tolerance)
    out_f32 = stem_in_forward(x, conv_w, gamma, beta, run_mean, run_var, eps,
                              compute_dtype=jnp.float32)
    out_f32 = jax.block_until_ready(out_f32)
    assert out_f32.shape == (N, Cout, H // 2, W // 2), out_f32.shape
    assert jnp.allclose(out_f32, ref, rtol=1e-4, atol=1e-4), float(
        jnp.max(jnp.abs(out_f32 - ref)))

    # 2) optimized bf16 fast path (f32 accumulate) -- looser tolerance
    out = stem_in_forward(x, conv_w, gamma, beta, run_mean, run_var, eps)
    out = jax.block_until_ready(out)
    assert out.shape == (N, Cout, H // 2, W // 2), out.shape
    assert jnp.allclose(out, ref, rtol=1e-1, atol=1e-1), float(
        jnp.max(jnp.abs(out - ref)))

    print("KERNEL_OK")
</pallas_src>

<mosaic_0001>
module attributes {stable_mosaic.version = 11 : i64} {
  func.func @_stem_kernel(%arg0: i32, %arg1: memref<16x144xf32, #tpu.memory_space<vmem>>, %arg2: memref<144x128xf32, #tpu.memory_space<vmem>>, %arg3: memref<1x128xf32, #tpu.memory_space<vmem>>, %arg4: memref<16x128xf32, #tpu.memory_space<vmem>>) attributes {dimension_semantics = [#tpu.dimension_semantics<parallel>], iteration_bounds = array<i64: 2>, scalar_prefetch = 0 : i64, scratch_operands = 0 : i64, tpu.core_type = #tpu.core_type<tc>, window_params = [{transform_indices = @transform_0, window_bounds = array<i64: 16, 144>}, {pipeline_mode = #tpu.pipeline_mode<synchronous>, transform_indices = @transform_1, window_bounds = array<i64: 144, 128>}, {pipeline_mode = #tpu.pipeline_mode<synchronous>, transform_indices = @transform_2, window_bounds = array<i64: 1, 128>}, {transform_indices = @transform_3, window_bounds = array<i64: 16, 128>}]} {
    %c0 = arith.constant 0 : index
    %c0_0 = arith.constant 0 : index
    %0 = vector.load %arg1[%c0, %c0_0] : memref<16x144xf32, #tpu.memory_space<vmem>>, vector<16x144xf32>
    %c0_1 = arith.constant 0 : index
    %c0_2 = arith.constant 0 : index
    %1 = vector.load %arg2[%c0_1, %c0_2] : memref<144x128xf32, #tpu.memory_space<vmem>>, vector<144x128xf32>
    %cst = arith.constant dense<0.000000e+00> : vector<16x128xf32>
    %2 = tpu.matmul %0, %1, %cst {dimension_numbers = #tpu.dot_dimension_numbers<[1], [0], [0], [1], [0, 0, 1, 1], [], []>} : vector<16x144xf32>, vector<144x128xf32>, vector<16x128xf32> -> vector<16x128xf32>
    %c0_3 = arith.constant 0 : index
    %c0_4 = arith.constant 0 : index
    %3 = vector.load %arg3[%c0_3, %c0_4] : memref<1x128xf32, #tpu.memory_space<vmem>>, vector<1x128xf32>
    %4 = vector.broadcast %3 : vector<1x128xf32> to vector<16x128xf32>
    %5 = arith.addf %2, %4 : vector<16x128xf32>
    %6 = arith.negf %5 : vector<16x128xf32>
    %7 = math.exp %6 : vector<16x128xf32>
    %cst_5 = arith.constant 1.000000e+00 : f32
    %8 = vector.broadcast %cst_5 : f32 to vector<16x128xf32>
    %9 = arith.addf %8, %7 : vector<16x128xf32>
    %10 = arith.divf %8, %9 : vector<16x128xf32>
    %11 = arith.mulf %5, %10 : vector<16x128xf32>
    %c0_6 = arith.constant 0 : index
    %c0_7 = arith.constant 0 : index
    %12 = vector.load %arg4[%c0_6, %c0_7] : memref<16x128xf32, #tpu.memory_space<vmem>>, vector<16x128xf32>
    tpu.vector_store %arg4[%c0_6, %c0_7], %11 {strides = array<i32>} : memref<16x128xf32, #tpu.memory_space<vmem>>, vector<16x128xf32>,
    return
  }
  func.func @transform_0(%arg0: i32) -> (i32, i32) {
    %c0_i32 = arith.constant 0 : i32
    %c0_i32_0 = arith.constant 0 : i32
    return %arg0, %c0_i32 : i32, i32
  }
  func.func @transform_1(%arg0: i32) -> (i32, i32) {
    %c0_i32 = arith.constant 0 : i32
    %c0_i32_0 = arith.constant 0 : i32
    %c0_i32_1 = arith.constant 0 : i32
    return %c0_i32, %c0_i32_0 : i32, i32
  }
  func.func @transform_2(%arg0: i32) -> (i32, i32) {
    %c0_i32 = arith.constant 0 : i32
    %c0_i32_0 = arith.constant 0 : i32
    %c0_i32_1 = arith.constant 0 : i32
    return %c0_i32, %c0_i32_0 : i32, i32
  }
  func.func @transform_3(%arg0: i32) -> (i32, i32) {
    %c0_i32 = arith.constant 0 : i32
    %c0_i32_0 = arith.constant 0 : i32
    return %arg0, %c0_i32 : i32, i32
  }
}

</mosaic_0001>

<bundles_post_ra>
// kernel: tpu_custom_call.1
= control target key start
LH: loop header
LB: loop body
LE: loop exit
PB: predicated region body
PF: predicated region fallthrough
CT: control target
= control target key end

     0   :  { %8 = vsyncpa [#allocation3], 0  ;;  %s962_s0 = inlined_call_operand.hbm [shape: f32[32,144], index: 0, kind: input, shape index: {}]   ;;  %s963_s1 = inlined_call_operand.hbm [shape: f32[144,128], index: 1, kind: input, shape index: {}]   ;;  %s964_s2 = inlined_call_operand.vmem [shape: f32[1,128], index: 2, kind: input, shape index: {}]   ;;  %s965_s3 = inlined_call_operand.hbm [shape: f32[32,128], index: 3, kind: output, shape index: {}]  }
   0x1   :  { %10 = vsyncpa [#allocation3 + $0x1], 0 }
   0x2   :  { %11 = vsyncpa [#allocation6], 0 }
   0x3   :  { %12 = vsyncpa [#allocation4], 0 }
   0x4   :  { %14 = vsyncpa [#allocation4 + $0x1], 0  ;;  %s733_s12 = smov 0   ;;  %s735_s13 = smov 0  }
   0x5   :  { %s737_s14 = smov 0   ;;  %s739_s15 = smov 0  }
   0x6 LB: > { %s754_s16 = sadd.s32 4294967295, %s701_s15   ;;  %s431_s17 = sadd.s32 4294967294, %s701_s15   ;;  %s701_s15 = sphi %s739_s15, %s985_s15   ;;  %s697_s14 = sphi %s737_s14, %s984_s14   ;;  %s693_s13 = sphi %s735_s13, %s983_s13   ;;  %s689_s12 = sphi %s733_s12, %s982_s12  }
   0x7   : > { %p40_p0 = scmp.ne.s32.totalorder %s693_s13, %s689_s12  ;;  %p966_p1 = scmp.eq.s32.totalorder %s754_s16, 0 }
   0x8   : > { %p112_p3 = scmp.eq.s32.totalorder %s431_s17, 1  ;;  %p432_p5 = scmp.ge.s32.totalorder %s701_s15, 1 }
   0x9   : > { %p763_p4 = por %p966_p1, %p40_p0  ;;  %p119_p7 = scmp.lt.s32.totalorder %s701_s15, 3 }
   0xa   : > { %p768_p6 = por %p112_p3, %p40_p0  ;;  %s703_s21 = smov [#allocation5]  }
   0xb   : > { %s969_s18 = scalar_select %p763_p4, 1, 0 }
   0xc   : > { %s970_s19 = scalar_select %p768_p6, 1, 0 }
   0xd   : > { %p773_p8 = pnand %p432_p5, %p119_p7  ;;  %s131_s22 = sshll.u32 %s703_s21, 4  ;;  %s777_s22 = int_to_ptr.vmem [resolvable:$true] %s131_s22 }
   0xe   : > { %s789_s24 = sadd.s32 1, %s701_s15   ;;  %s27_s25 = sadd.s32 1, %s697_s14 }
   0xf   : > { %s971_s20 = scalar_select %p773_p8, 1, 0 }
  0x10   : > { %p509_p9 = pneg %p773_p8  ;;  %s24_s26 = ssub.s32 %s701_s15, %s789_s24 }
  0x11   : > { %s573_s29 = scalar_lea.hbm %s963_s1, 2304 }
  0x12   : > { %p784_p11 = pnand %p509_p9, %p966_p1  ;;  %p574_p12 = scmp.ne.s32.totalorder %s963_s1, %s573_s29 }
  0x13   : > { %p580_p5 = scmp.lt.u32.totalorder %s573_s29, %s963_s1 }
  0x14   : > { %p575_p13 = pneg %p784_p11 }
  0x16   : > { %p576_p0 = pnand %p575_p13, %p574_p12 }
  0x18   : > { %p577_p3 = pneg %p576_p0 }
  0x1a   : > { %p582_p7 = pnand %p580_p5, %p577_p3 }
  0x1c   : > { %585 = shalt.err (!%p582_p7)
}
  0x1d   : > { %s586_s7 = scalar_lea.vmem %s777_s22, 2304  ;;  %p594_p2 = scmp.lt.s32.totalorder %s777_s22, %s777_s22 }
  0x1e   : > { %p587_p9 = scmp.ne.s32.totalorder %s777_s22, %s586_s7  ;;  %p595_p6 = scmp.lt.s32.totalorder %s586_s7, %s586_s7 }
  0x20   : > { %p589_p10 = pnand %p587_p9, %p575_p13  ;;  %p596_p4 = por %p595_p6, %p594_p2 }
  0x22   : > { %p590_p1 = pneg %p589_p10 }
  0x24   : > { %p597_p8 = pnand %p596_p4, %p590_p1 }
  0x26   : > { %600 = shalt.err (!%p597_p8)
}
  0x27   : > { %s704_s8 = smov 128   ;;  %s705_s9 = smov 8  }
  0x28   : > { %512 = dma.hbm_to_vmem [thread:$0]  (!%p784_p11), %s963_s1, 2304, %s777_s22, [#allocation6], %s704_s8, %s704_s8, %s705_s9  }
  0x29   : > { %p25_p2 = scmp.eq.s32.totalorder %s24_s26, 0  ;;  %p34_p1 = scmp.ne.s32.totalorder %s697_s14, %s693_s13 }
  0x2a   : > { %p35_p4 = scmp.eq.s32.totalorder %s701_s15, 0  ;;  %p522_p6 = scmp.lt.s32.totalorder %s701_s15, 2 }
  0x2b   : > { %s820_s17 = scalar_select %p25_p2, %s697_s14, %s27_s25  }
  0x2c   : > { %p36_p8 = por %p35_p4, %p34_p1  ;;  %p973_p10 = scmp.eq.s32.totalorder %s754_s16, 1 }
  0x2d   : > { %s148_s27 = sand.u32 1, %s697_s14   ;;  %s454_s28 = sshll.u32 %s701_s15, 9 }
  0x2e   : > { %p824_p12 = por %p973_p10, %p34_p1  ;;  %s435_s29 = sshll.u32 %s148_s27, 5 }
  0x2f   : > { %s833_s4 = scalar_lea.hbm %s962_s0, %s454_s28  ;;  %s152_s22 = scalar_lea.vmem [#allocation2], %s435_s29 }
  0x30   : > { %s160_s25 = sshll.u32 %s152_s22, 4  ;;  %p835_p11 = pnand %p522_p6, %p36_p8  ;;  %s839_s25 = int_to_ptr.vmem [resolvable:$true] %s160_s25 }
  0x31   : > { %s841_s5 = scalar_lea.sflag [#allocation3], %s148_s27  ;;  %s601_s6 = scalar_lea.hbm %s833_s4, 512 }
  0x32   : > { %p602_p13 = scmp.ne.s32.totalorder %s833_s4, %s601_s6  ;;  %p603_p0 = pneg %p835_p11 }
  0x33   : > { %s606_s9 = scalar_lea.hbm %s962_s0, 1024  ;;  %p607_p7 = scmp.lt.u32.totalorder %s833_s4, %s962_s0 }
  0x34   : > { %p604_p3 = pnand %p603_p0, %p602_p13  ;;  %p608_p9 = scmp.lt.u32.totalorder %s606_s9, %s601_s6 }
  0x35   : > { %p610_p1 = scmp.lt.u32.totalorder %s601_s6, %s833_s4 }
  0x36   : > { %p605_p5 = pneg %p604_p3  ;;  %p609_p2 = por %p608_p9, %p607_p7 }
  0x38   : > { %p611_p4 = por %p610_p1, %p609_p2 }
  0x3a   : > { %p612_p6 = pnand %p611_p4, %p605_p5 }
  0x3c   : > { %615 = shalt.err (!%p612_p6)
}
  0x3d   : > { %s616_s27 = scalar_lea.vmem %s839_s25, 512  ;;  %s706_s28 = smov [#allocation2]  }
  0x3e   : > { %p617_p8 = scmp.ne.s32.totalorder %s839_s25, %s616_s27  ;;  %s621_s29 = sshll.u32 %s706_s28, 4  ;;  %s622_s29 = int_to_ptr.vmem [resolvable:$false] %s621_s29 }
  0x3f   : > { %s623_s23 = scalar_lea.vmem %s622_s29, 1024  ;;  %p624_p3 = scmp.lt.s32.totalorder %s839_s25, %s622_s29 }
  0x40   : > { %p619_p10 = pnand %p617_p8, %p603_p0  ;;  %p625_p7 = scmp.lt.s32.totalorder %s623_s23, %s616_s27 }
  0x42   : > { %p620_p13 = pneg %p619_p10  ;;  %p626_p9 = por %p625_p7, %p624_p3 }
  0x44   : > { %p627_p2 = pnand %p626_p9, %p620_p13 }
  0x46   : > { %630 = shalt.err (!%p627_p2)
}
  0x47   : > { %s707_s30 = smov 256   ;;  %s708_s22 = smov 16  }
  0x48   : > { %516 = dma.hbm_to_vmem [thread:$0]  (!%p835_p11), %s833_s4, 512, %s839_s25, %s841_s5, %s707_s30, %s707_s30, %s708_s22  }
  0x49   : > { %p976_p0 = scmp.ne.s32.totalorder %s971_s20, 0 }
  0x4a   : > { %s872_s6 = sand.u32 (!%p976_p0), 1, %s693_s13   ;;  %p977_p5 = scmp.ne.s32.totalorder (!%p976_p0), %s969_s18, 0 }
  0x4b   : > { %172 = sbr.rel (%p976_p0) target bundleno = 382 (0x17e), region = 32  ;;  %s440_s7 = sshll.u32 (!%p976_p0), %s872_s6, 5 }
  0x4c   : > { %s175_s8 = scalar_lea.sflag (!%p976_p0), [#allocation3], %s872_s6  ;;  %s876_s9 = scalar_lea.vmem (!%p976_p0), [#allocation2], %s440_s7 }
  0x52   : > { %676 = dma.done.wait (%p977_p5), %s175_s8, 512  }
  0x53   : > { %678 = vsyncadd (%p977_p5), %s175_s8, 4294966784  ;;  %p978_p11 = scmp.eq.s32.totalorder %s754_s16, 0 }
  0x55   : > { %680 = dma.done.wait (%p978_p11), [#allocation6], 2304   ;;  %p979_p1 = pmov %p978_p11 }
  0x56   : > { %v709_v0 = vmov 0.0|0.0   ;;  %v211_v1 = vld [vmem:[#allocation5] sm:$0xff]  ;;  %v212_v2 = vld [vmem:[#allocation5 + $0x8] sm:$0xff]  ;;  %v213_v3 = vld [vmem:[#allocation5 + $0x10] sm:$0xff]  ;;  %vm236_vm0 = vcmask 130048   ;;  %s442_s4 = sshll.u32 %s872_s6, 4 }
  0x57   : > { %682 = vsyncadd (%p979_p1), [#allocation6], 4294964992  ;;  %456 = vmatprep.subr.bf16.mxu0 %v709_v0  ;;  %483 = vmatprep.subr.bf16.mxu1 %v709_v0  ;;  %v457_v4 = vpack.c.bf16 %v212_v2, %v211_v1  ;;  %v214_v5 = vld [vmem:[#allocation5 + $0x18] sm:$0xff]  ;;  %v215_v7 = vld [vmem:[#allocation5 + $0x20] sm:$0xff]  ;;  %s204_s25 = scalar_lea.vmem [#allocation7], %s442_s4  ;;  %s455_s5 = sshll.u32 %s754_s16, 8 }
  0x58   : > { %v460_v6 = vpack.c.bf16 %v214_v5, %v213_v3  ;;  %v216_v8 = vld [vmem:[#allocation5 + $0x28] sm:$0xff]  ;;  %v210_v10 = vld [vmem:[%s876_s9 + $0x18] sm:$0xff]  ;;  %v217_v12 = vld [vmem:[#allocation5 + $0x30] sm:$0xff]  ;;  %s348_s26 = sshll.u32 %s204_s25, 4  ;;  %s918_s27 = scalar_lea.hbm %s965_s3, %s455_s5  ;;  %s913_s26 = int_to_ptr.vmem [resolvable:$true] %s348_s26 }
  0x59   : > { %458 = vmatpush1.bf16.msra.mxu0 %v457_v4  ;;  %492 = vmatpush1.bf16.msra.mxu1 %v457_v4  ;;  %v208_v9 = vld [vmem:[%s876_s9 + $0x8] sm:$0xff]  ;;  %v463_v11 = vpack.c.bf16 %v216_v8, %v215_v7  ;;  %v218_v13 = vld [vmem:[#allocation5 + $0x38] sm:$0xff]  ;;  %v219_v15 = vld [vmem:[#allocation5 + $0x40] sm:$0xff]  ;;  %s335_s28 = scalar_lea.sflag [#allocation4], %s872_s6  ;;  %s631_s29 = scalar_lea.vmem %s913_s26, 256 }
  0x5a   : > { %459 = vmatprep.subr.bf16.mxu0 %v709_v0  ;;  %484 = vmatprep.subr.bf16.mxu1 %v709_v0  ;;  %v466_v14 = vpack.c.bf16 %v218_v13, %v217_v12  ;;  %v220_v16 = vld [vmem:[#allocation5 + $0x48] sm:$0xff]  ;;  %v221_v18 = vld [vmem:[#allocation5 + $0x50] sm:$0xff]  ;;  %v222_v19 = vld [vmem:[#allocation5 + $0x58] sm:$0xff]  ;;  %p632_p4 = scmp.ne.s32.totalorder %s913_s26, %s631_s29  ;;  %s710_s16 = smov [#allocation7]  }
  0x5b   : > { %444 = vmatprep.mubr.msk.f32.mxu0 %vm236_vm0, %v208_v9  ;;  %445 = vmatprep.mubr.msk.f32.mxu1 %vm236_vm0, %v210_v10  ;;  %v469_v17 = vpack.c.bf16 %v220_v16, %v219_v15  ;;  %v472_v20 = vpack.c.bf16 %v222_v19, %v221_v18  ;;  %v223_v21 = vld [vmem:[#allocation5 + $0x60] sm:$0xff]  ;;  %v224_v22 = vld [vmem:[#allocation5 + $0x68] sm:$0xff]  ;;  %v225_v24 = vld [vmem:[#allocation5 + $0x70] sm:$0xff]  ;;  %s635_s23 = sshll.u32 %s710_s16, 4  ;;  %s636_s23 = int_to_ptr.vmem [resolvable:$false] %s635_s23 }
  0x5c   : > { %v475_v23 = vpack.c.bf16 %v224_v22, %v223_v21  ;;  %v226_v25 = vld [vmem:[#allocation5 + $0x78] sm:$0xff]  ;;  %v227_v27 = vld [vmem:[#allocation5 + $0x80] sm:$0xff]  ;;  %v228_v28 = vld [vmem:[#allocation5 + $0x88] sm:$0xff]  ;;  %p633_p6 = pnand %p632_p4, %p824_p12  ;;  %s637_s30 = scalar_lea.vmem %s636_s23, 512 }
  0x5d   : > { %461 = vmatpush1.bf16.msra.mxu0 %v460_v6  ;;  %493 = vmatpush1.bf16.msra.mxu1 %v460_v6  ;;  %v478_v26 = vpack.c.bf16 %v226_v25, %v225_v24  ;;  %v481_v29 = vpack.c.bf16 %v228_v28, %v227_v27  ;;  %v207_v30 = vld [vmem:[%s876_s9] sm:$0xff]  ;;  %v209_v31 = vld [vmem:[%s876_s9 + $0x10] sm:$0xff]  ;;  %p638_p10 = scmp.lt.s32.totalorder %s913_s26, %s636_s23  ;;  %p639_p13 = scmp.lt.s32.totalorder %s637_s30, %s631_s29 }
  0x5e   : > { %462 = vmatprep.subr.bf16.mxu0 %v709_v0  ;;  %485 = vmatprep.subr.bf16.mxu1 %v709_v0  ;;  %v443_v32 = vld [vmem:[%s964_s2] ss:$0 sm:$0xff]  ;;  %p634_p8 = pneg %p633_p6 }
  0x5f   : > { %p640_p3 = por %p639_p13, %p638_p10 }
  0x61   : > { %464 = vmatpush1.bf16.msra.mxu0 %v463_v11  ;;  %494 = vmatpush1.bf16.msra.mxu1 %v463_v11  ;;  %p641_p7 = pnand %p640_p3, %p634_p8 }
  0x62   : > { %465 = vmatprep.subr.bf16.mxu0 %v709_v0  ;;  %486 = vmatprep.subr.bf16.mxu1 %v709_v0 }
  0x65   : > { %467 = vmatpush1.bf16.msra.mxu0 %v466_v14  ;;  %495 = vmatpush1.bf16.msra.mxu1 %v466_v14 }
  0x66   : > { %468 = vmatprep.subr.bf16.mxu0 %v709_v0  ;;  %487 = vmatprep.subr.bf16.mxu1 %v709_v0 }
  0x69   : > { %470 = vmatpush1.bf16.msra.mxu0 %v469_v17  ;;  %496 = vmatpush1.bf16.msra.mxu1 %v469_v17 }
  0x6a   : > { %471 = vmatprep.subr.bf16.mxu0 %v709_v0  ;;  %488 = vmatprep.subr.bf16.mxu1 %v709_v0 }
  0x6d   : > { %473 = vmatpush1.bf16.msra.mxu0 %v472_v20  ;;  %497 = vmatpush1.bf16.msra.mxu1 %v472_v20 }
  0x6e   : > { %474 = vmatprep.subr.bf16.mxu0 %v709_v0  ;;  %489 = vmatprep.subr.bf16.mxu1 %v709_v0 }
  0x71   : > { %476 = vmatpush1.bf16.msra.mxu0 %v475_v23  ;;  %498 = vmatpush1.bf16.msra.mxu1 %v475_v23 }
  0x72   : > { %477 = vmatprep.subr.bf16.mxu0 %v709_v0  ;;  %490 = vmatprep.subr.bf16.mxu1 %v709_v0 }
  0x75   : > { %479 = vmatpush1.bf16.msra.mxu0 %v478_v26  ;;  %499 = vmatpush1.bf16.msra.mxu1 %v478_v26 }
  0x76   : > { %480 = vmatprep.subr.bf16.mxu0 %v709_v0  ;;  %491 = vmatprep.subr.bf16.mxu1 %v709_v0 }
  0x79   : > { %482 = vmatpush1.bf16.msra.mxu0 %v481_v29  ;;  %500 = vmatpush1.bf16.msra.mxu1 %v481_v29 }
  0x7c   : > { %308 = vmatmul.mubr.f32.vlgmr.msra.gmra.mrb[0].mxu0 %v207_v30  ;;  %313 = vmatmul.mubr.f32.vlgmr.msra.gmra.mrb[0].mxu1 %v209_v31 }
 0x14f   : > { %v309_v33 = vpop.f32.mrb[0].mxu0  ;;  %v314_v34 = vpop.f32.mrb[0].mxu1 }
 0x150   : > { %v310_v35 = vadd.f32 %v443_v32, %v309_v33  ;;  %v315_v36 = vadd.f32 %v443_v32, %v314_v34  ;;  %v311_v37 = vpop.f32.mrb[1].mxu0  ;;  %v316_v38 = vpop.f32.mrb[1].mxu1 }
 0x152   : > { %v446_v39 = vmul.f32 -1.442695, %v310_v35  ;;  %v447_v40 = vmul.f32 -1.442695, %v315_v36 }
 0x154   : > { %565 = vpow2.f32 %v446_v39 }
 0x155   : > { %567 = vpow2.f32 %v447_v40 }
 0x15e   : > { %v566_v41 = vpop.eup %565 }
 0x15f   : > { %v568_v42 = vpop.eup %567  ;;  %v324_v43 = vadd.f32 1.0, %v566_v41 }
 0x160   : > { %v325_v44 = vadd.f32 1.0, %v568_v42 }
 0x161   : > { %569 = vrcp.f32 %v324_v43 }
 0x162   : > { %571 = vrcp.f32 %v325_v44 }
 0x16b   : > { %v570_v45 = vpop.eup %569 }
 0x16c   : > { %v572_v46 = vpop.eup %571  ;;  %v330_v47 = vmul.f32 %v570_v45, %v310_v35 }
 0x16d   : > { %v331_v48 = vmul.f32 %v572_v46, %v315_v36 }
 0x16e   : > { %332 = vst [vmem:[%s204_s25] sm:$0xff] %v330_v47 }
 0x16f   : > { %333 = vst [vmem:[%s204_s25 + $0x8] sm:$0xff] %v331_v48 }
 0x170   : > { %644 = shalt.err (!%p641_p7)
}
 0x171   : > { %s645_s22 = scalar_lea.hbm %s918_s27, 256  ;;  %s649_s9 = scalar_lea.hbm %s965_s3, 512 }
 0x172   : > { %p646_p9 = scmp.ne.s32.totalorder %s918_s27, %s645_s22  ;;  %p650_p5 = scmp.lt.u32.totalorder %s918_s27, %s965_s3 }
 0x173   : > { %p651_p11 = scmp.lt.u32.totalorder %s649_s9, %s645_s22  ;;  %p653_p4 = scmp.lt.u32.totalorder %s645_s22, %s918_s27 }
 0x174   : > { %p647_p2 = pnand %p646_p9, %p824_p12 }
 0x175   : > { %p652_p1 = por %p651_p11, %p650_p5 }
 0x176   : > { %p648_p0 = pneg %p647_p2 }
 0x177   : > { %p654_p6 = por %p653_p4, %p652_p1 }
 0x179   : > { %p655_p8 = pnand %p654_p6, %p648_p0 }
 0x17b   : > { %658 = shalt.err (!%p655_p8)
}
 0x17c   : > { %s711_s4 = smov 128   ;;  %s712_s25 = smov 8  }
 0x17d   : > { %507 = dma.vmem_to_hbm [thread:$0]  (%p824_p12), %s913_s26, 256, %s918_s27, %s335_s28, %s711_s4, %s711_s4, %s712_s25  }
 0x17e PF: > { %s363_s5 = sand.u32 1, %s689_s12   ;;  %p980_p10 = scmp.ne.s32.totalorder %s970_s19, 0 }
 0x17f   : > { %p981_p13 = scmp.ge.s32.totalorder %s701_s15, 2  ;;  %s364_s10 = scalar_lea.sflag [#allocation4], %s363_s5 }
 0x181   : > { %p518_p3 = pnand %p981_p13, %p980_p10 }
 0x183   : > { %684 = dma.done.wait (!%p518_p3), %s364_s10, 256  }
 0x184   : > { %686 = vsyncadd (!%p518_p3), %s364_s10, 4294967040  ;;  %p17_p7 = scmp.ge.s32.totalorder %s789_s24, 4   ;;  %s982_s12 = smov %s693_s13 }
 0x185   : > { %s983_s13 = smov %s697_s14  ;;  %s984_s14 = smov %s820_s17 }
 0x186   : > { %s985_s15 = smov %s789_s24  ;;  %19 = sbr.rel (!%p17_p7) target bundleno = 6 (0x6), region = 81 }
 0x18d   :  { %369 = vsyncpa [#allocation3], 1 }
 0x18e   :  { %371 = vsyncpa [#allocation3 + $0x1], 1 }
 0x18f   :  { %372 = vsyncpa [#allocation6], 1 }
 0x190   :  { %373 = vsyncpa [#allocation4], 1 }
 0x191   :  { %375 = vsyncpa [#allocation4 + $0x1], 1 }

</bundles_post_ra>
